<compile_context>
chip_gen: v7x
topology: tpu7x:2x2x1
jax: 0.10.0
libtpu: 0.0.40
codegen_flags: <defaults>
</compile_context>

<pallas_src>
import functools

import jax
import jax.numpy as jnp
from jax.experimental import pallas as pl
from jax.experimental.pallas import tpu as pltpu


def _vae_loss_kernel(recon_ref, x_ref, mu_ref, logvar_ref,
                     sse_ref, kld_ref, acc_ref, *,
                     rows, lane, acc_rows, total_rows,
                     tiles_per_slice, n_full_tiles, need_mask):
    c = pl.program_id(0)            # core-slice index ("parallel")
    k = pl.program_id(1)            # sequential reduction step ("arbitrary")
    t = c * tiles_per_slice + k     # global tile index (may exceed real tile count)

    @pl.when(k == 0)
    def _():
        acc_ref[...] = jnp.zeros_like(acc_ref)

    def _accumulate(masked):
        diff = recon_ref[...].astype(jnp.float32) - x_ref[...].astype(jnp.float32)
        if masked:
            row = t * rows + jax.lax.broadcasted_iota(jnp.int32, diff.shape, 0)
            diff = jnp.where(row < total_rows, diff, 0.0)
        sq = diff * diff
        if rows == acc_rows:
            acc_ref[...] += sq
        else:
            # Leading-axis reduce: pure VPU vreg adds into the tiny (8, lane) accumulator.
            acc_ref[...] += jnp.sum(sq.reshape(rows // acc_rows, acc_rows, lane), axis=0)

    if need_mask:
        # Only the last (ragged) real tile and any phantom tile pay the mask cost.
        @pl.when(t < n_full_tiles)
        def _():
            _accumulate(False)

        @pl.when(t >= n_full_tiles)
        def _():
            _accumulate(True)
    else:
        _accumulate(False)

    @pl.when(k == pl.num_programs(1) - 1)
    def _():
        # Per-slice partial SSE (per-lane partials; the tiny final sum runs in the wrapper).
        sse_ref[...] = acc_ref[...].reshape(1, acc_rows, lane)
        mu = mu_ref[...].astype(jnp.float32)
        lv = logvar_ref[...].astype(jnp.float32)
        kld = -0.5 * jnp.sum(1.0 + lv - mu * mu - jnp.exp(lv))
        kld_ref[...] = jnp.full(kld_ref.shape, kld, jnp.float32)


def _vmem_capacity_bytes():
    try:
        return int(pltpu.get_tpu_info().vmem_capacity_bytes)
    except Exception:  # unknown / query unavailable -> assume smallest (v7x-like)
        return 64 * 1024 * 1024


def vae_loss_mse(recon_x, x, mu, logvar, *, variational_beta):
    """Pallas implementation of VaeLossMSE.forward. Returns (total_loss, kld) scalars."""
    beta = float(variational_beta)
    recon_flat = recon_x.reshape(-1)
    x_flat = x.reshape(-1)
    n = recon_flat.shape[0]
    itemsize = jnp.dtype(recon_x.dtype).itemsize

    # Handle the sub-128-element tail with a tiny jnp sum instead of padding (avoids an
    # extra full HBM copy of both tensors for an otherwise HBM-bound kernel).
    n_main = (n // 128) * 128
    tail_sse = jnp.float32(0.0)
    if n_main < n:
        tail_sse = jnp.sum((recon_flat[n_main:].astype(jnp.float32)
                            - x_flat[n_main:].astype(jnp.float32)) ** 2)

    if n_main == 0:
        # Degenerate tiny input (< 128 elements): nothing worth streaming through Pallas.
        lv = logvar.astype(jnp.float32)
        m = mu.astype(jnp.float32)
        kld = -0.5 * jnp.sum(1.0 + lv - m * m - jnp.exp(lv))
        return tail_sse + beta * kld, kld

    recon_main = recon_flat[:n_main]
    x_main = x_flat[:n_main]

    # Lane width: largest multiple of 128 (<= 1024) dividing the element count.
    lane = 128
    for cand in (1024, 512, 256):
        if n_main % cand == 0:
            lane = cand
            break
    total_rows = n_main // lane

    # Generation-aware tiling: v7x has 64 MiB VMEM / TC, v5e/v6e have 128 MiB.
    vmem_cap = _vmem_capacity_bytes()
    if vmem_cap >= 96 * 1024 * 1024:          # v5e / v6e
        max_block_f32_bytes = 8 * 1024 * 1024
        vmem_limit = 64 * 1024 * 1024
    else:                                     # v7x or unknown
        max_block_f32_bytes = 4 * 1024 * 1024
        vmem_limit = 40 * 1024 * 1024

    # dtype-native sublane packing for the row tile (8 f32, 16 bf16, 32 for 1-byte types).
    sub = 8 * max(1, 4 // itemsize)
    if total_rows <= sub:
        rows = total_rows                     # single tile: block equals full array dims
    else:
        # Budget rows by the f32 in-kernel working set (diff/square are f32 regardless of
        # input dtype); HBM DMA per block is itemsize*rows*lane (smaller for bf16).
        budget_rows = max(sub, max_block_f32_bytes // (4 * lane))
        rows = min(total_rows, budget_rows)
        rows = max(sub, (rows // sub) * sub)
    acc_rows = 8 if rows % 8 == 0 else rows

    n_tiles = pl.cdiv(total_rows, rows)
    # Split the streaming reduction across 2 TensorCores when worthwhile. Correct on
    # single-core chips too (the "parallel" axis just runs sequentially). Only allow an
    # odd tile count (one phantom tile of wasted DMA) when the relative waste is small.
    if n_tiles >= 2 and (n_tiles % 2 == 0 or n_tiles >= 8):
        num_splits = 2
    else:
        num_splits = 1
    tiles_per_slice = pl.cdiv(n_tiles, num_splits)
    n_tiles_padded = num_splits * tiles_per_slice
    n_full_tiles = total_rows // rows
    need_mask = (n_tiles_padded * rows) != total_rows

    recon_2d = recon_main.reshape(total_rows, lane)
    x_2d = x_main.reshape(total_rows, lane)

    if n_tiles_padded > n_tiles:
        def row_map(c, k):                    # clamp phantom tiles to the last real tile
            return (jnp.minimum(c * tiles_per_slice + k, n_tiles - 1), 0)
    else:
        def row_map(c, k):
            return (c * tiles_per_slice + k, 0)

    B, L = mu.shape
    kernel = functools.partial(
        _vae_loss_kernel,
        rows=rows, lane=lane, acc_rows=acc_rows, total_rows=total_rows,
        tiles_per_slice=tiles_per_slice, n_full_tiles=n_full_tiles,
        need_mask=need_mask)

    cost = pl.CostEstimate(
        flops=3 * n_main + 6 * mu.size,
        transcendentals=mu.size,
        bytes_accessed=2 * n_main * itemsize + 2 * mu.size * jnp.dtype(mu.dtype).itemsize)

    sse_partial, kld_out = pl.pallas_call(
        kernel,
        out_shape=(jax.ShapeDtypeStruct((num_splits, acc_rows, lane), jnp.float32),
                   jax.ShapeDtypeStruct((num_splits, 8, 128), jnp.float32)),
        grid_spec=pltpu.PrefetchScalarGridSpec(
            num_scalar_prefetch=0,
            grid=(num_splits, tiles_per_slice),
            in_specs=[
                pl.BlockSpec((rows, lane), row_map),          # recon slab tile
                pl.BlockSpec((rows, lane), row_map),          # x slab tile
                pl.BlockSpec((B, L), lambda c, k: (0, 0)),    # mu (resident)
                pl.BlockSpec((B, L), lambda c, k: (0, 0)),    # logvar (resident)
            ],
            out_specs=(
                pl.BlockSpec((1, acc_rows, lane), lambda c, k: (c, 0, 0)),  # per-slice SSE
                pl.BlockSpec((1, 8, 128), lambda c, k: (c, 0, 0)),          # per-slice KLD
            ),
            scratch_shapes=[pltpu.VMEM((acc_rows, lane), jnp.float32)],
        ),
        compiler_params=pltpu.CompilerParams(
            dimension_semantics=("parallel", "arbitrary"),
            vmem_limit_bytes=vmem_limit,
        ),
        cost_estimate=cost,
    )(recon_2d, x_2d, mu, logvar)

    sse = jnp.sum(sse_partial) + tail_sse    # tiny (<= 2*8*1024 elems) fused XLA reduce
    kld = kld_out[0, 0, 0]                   # every slice wrote the same value
    loss = sse + beta * kld
    return loss, kld


def _reference(recon_x, x, mu, logvar, beta):
    b = recon_x.shape[0]
    recon_loss = jnp.sum((recon_x.reshape(b, -1).astype(jnp.float32)
                          - x.reshape(b, -1).astype(jnp.float32)) ** 2)
    kld = -0.5 * jnp.sum(1.0 + logvar - mu ** 2 - jnp.exp(logvar))
    return recon_loss + beta * kld, kld


if __name__ == "__main__":
    key = jax.random.PRNGKey(0)
    k1, k2, k3, k4 = jax.random.split(key, 4)

    B, C, H, W = 2, 4, 16, 16       # NCHW, as in the PyTorch forward
    LATENT = 32
    BETA = 0.5

    recon_x = jax.random.normal(k1, (B, C, H, W), dtype=jnp.float32)
    x = jax.random.normal(k2, (B, C, H, W), dtype=jnp.float32)
    mu = jax.random.normal(k3, (B, LATENT), dtype=jnp.float32)
    logvar = 0.1 * jax.random.normal(k4, (B, LATENT), dtype=jnp.float32)

    fn = jax.jit(functools.partial(vae_loss_mse, variational_beta=BETA))
    loss, kld = fn(recon_x, x, mu, logvar)
    jax.block_until_ready((loss, kld))

    ref_loss, ref_kld = _reference(recon_x, x, mu, logvar, BETA)
    assert jnp.allclose(loss, ref_loss, rtol=1e-4, atol=1e-3), (loss, ref_loss)
    assert jnp.allclose(kld, ref_kld, rtol=1e-5, atol=1e-4), (kld, ref_kld)

    # Second shape: exercises the multi-tile path, the 2-slice "parallel" split, and the
    # ragged last-tile masked path.
    B2, C2, H2, W2 = 2, 3, 40, 40
    recon2 = jax.random.normal(k1, (B2, C2, H2, W2), dtype=jnp.float32)
    x2 = jax.random.normal(k2, (B2, C2, H2, W2), dtype=jnp.float32)
    loss2, kld2 = jax.jit(functools.partial(vae_loss_mse, variational_beta=BETA))(
        recon2, x2, mu, logvar)
    jax.block_until_ready((loss2, kld2))
    ref_loss2, ref_kld2 = _reference(recon2, x2, mu, logvar, BETA)
    assert jnp.allclose(loss2, ref_loss2, rtol=1e-4, atol=1e-3), (loss2, ref_loss2)
    assert jnp.allclose(kld2, ref_kld2, rtol=1e-5, atol=1e-4), (kld2, ref_kld2)

    print("KERNEL_OK")
</pallas_src>

<mosaic_0001>
module attributes {stable_mosaic.version = 11 : i64} {
  func.func @_vae_loss_kernel(%arg0: i32, %arg1: i32, %arg2: memref<2x1024xf32, #tpu.memory_space<vmem>>, %arg3: memref<2x1024xf32, #tpu.memory_space<vmem>>, %arg4: memref<2x32xf32, #tpu.memory_space<vmem>>, %arg5: memref<2x32xf32, #tpu.memory_space<vmem>>, %arg6: memref<1x2x1024xf32, #tpu.memory_space<vmem>>, %arg7: memref<1x8x128xf32, #tpu.memory_space<vmem>>, %arg8: memref<2x1024xf32, #tpu.memory_space<vmem>>) attributes {dimension_semantics = [#tpu.dimension_semantics<parallel>, #tpu.dimension_semantics<arbitrary>], iteration_bounds = array<i64: 1, 1>, scalar_prefetch = 0 : i64, scratch_operands = 1 : i64, tpu.core_type = #tpu.core_type<tc>, window_params = [{transform_indices = @transform_0, window_bounds = array<i64: 2, 1024>}, {transform_indices = @transform_1, window_bounds = array<i64: 2, 1024>}, {pipeline_mode = #tpu.pipeline_mode<synchronous>, transform_indices = @transform_2, window_bounds = array<i64: 2, 32>}, {pipeline_mode = #tpu.pipeline_mode<synchronous>, transform_indices = @transform_3, window_bounds = array<i64: 2, 32>}, {transform_indices = @transform_4, window_bounds = array<i64: 1, 2, 1024>}, {transform_indices = @transform_5, window_bounds = array<i64: 1, 8, 128>}]} {
    %c0_i32 = arith.constant 0 : i32
    %0 = arith.cmpi eq, %arg1, %c0_i32 : i32
    %1 = arith.extui %0 : i1 to i32
    %c0_i32_0 = arith.constant 0 : i32
    %2 = arith.cmpi ne, %1, %c0_i32_0 : i32
    scf.if %2 {
      %cst = arith.constant 0.000000e+00 : f32
      %13 = vector.broadcast %cst : f32 to vector<2x1024xf32>
      %c0_10 = arith.constant 0 : index
      %c0_11 = arith.constant 0 : index
      %14 = vector.load %arg8[%c0_10, %c0_11] : memref<2x1024xf32, #tpu.memory_space<vmem>>, vector<2x1024xf32>
      tpu.vector_store %arg8[%c0_10, %c0_11], %13 {strides = array<i32>} : memref<2x1024xf32, #tpu.memory_space<vmem>>, vector<2x1024xf32>,
    } else {
    }
    %c0 = arith.constant 0 : index
    %c0_1 = arith.constant 0 : index
    %3 = vector.load %arg2[%c0, %c0_1] : memref<2x1024xf32, #tpu.memory_space<vmem>>, vector<2x1024xf32>
    %c0_2 = arith.constant 0 : index
    %c0_3 = arith.constant 0 : index
    %4 = vector.load %arg3[%c0_2, %c0_3] : memref<2x1024xf32, #tpu.memory_space<vmem>>, vector<2x1024xf32>
    %5 = arith.subf %3, %4 : vector<2x1024xf32>
    %6 = arith.mulf %5, %5 : vector<2x1024xf32>
    %c0_4 = arith.constant 0 : index
    %c0_5 = arith.constant 0 : index
    %7 = vector.load %arg8[%c0_4, %c0_5] : memref<2x1024xf32, #tpu.memory_space<vmem>>, vector<2x1024xf32>
    %8 = arith.addf %7, %6 : vector<2x1024xf32>
    %c0_6 = arith.constant 0 : index
    %c0_7 = arith.constant 0 : index
    %9 = vector.load %arg8[%c0_6, %c0_7] : memref<2x1024xf32, #tpu.memory_space<vmem>>, vector<2x1024xf32>
    tpu.vector_store %arg8[%c0_6, %c0_7], %8 {strides = array<i32>} : memref<2x1024xf32, #tpu.memory_space<vmem>>, vector<2x1024xf32>,
    %c0_i32_8 = arith.constant 0 : i32
    %10 = arith.cmpi eq, %arg1, %c0_i32_8 : i32
    %11 = arith.extui %10 : i1 to i32
    %c0_i32_9 = arith.constant 0 : i32
    %12 = arith.cmpi ne, %11, %c0_i32_9 : i32
    scf.if %12 {
      %c0_10 = arith.constant 0 : index
      %c0_11 = arith.constant 0 : index
      %13 = vector.load %arg8[%c0_10, %c0_11] : memref<2x1024xf32, #tpu.memory_space<vmem>>, vector<2x1024xf32>
      %14 = vector.shape_cast %13 : vector<2x1024xf32> to vector<1x2x1024xf32>
      %c0_12 = arith.constant 0 : index
      %c0_13 = arith.constant 0 : index
      %c0_14 = arith.constant 0 : index
      %15 = vector.load %arg6[%c0_12, %c0_13, %c0_14] : memref<1x2x1024xf32, #tpu.memory_space<vmem>>, vector<1x2x1024xf32>
      tpu.vector_store %arg6[%c0_12, %c0_13, %c0_14], %14 {strides = array<i32>} : memref<1x2x1024xf32, #tpu.memory_space<vmem>>, vector<1x2x1024xf32>,
      %c0_15 = arith.constant 0 : index
      %c0_16 = arith.constant 0 : index
      %16 = vector.load %arg4[%c0_15, %c0_16] : memref<2x32xf32, #tpu.memory_space<vmem>>, vector<2x32xf32>
      %c0_17 = arith.constant 0 : index
      %c0_18 = arith.constant 0 : index
      %17 = vector.load %arg5[%c0_17, %c0_18] : memref<2x32xf32, #tpu.memory_space<vmem>>, vector<2x32xf32>
      %cst = arith.constant 1.000000e+00 : f32
      %18 = vector.broadcast %cst : f32 to vector<2x32xf32>
      %19 = arith.addf %18, %17 : vector<2x32xf32>
      %20 = arith.mulf %16, %16 : vector<2x32xf32>
      %21 = arith.subf %19, %20 : vector<2x32xf32>
      %22 = math.exp %17 : vector<2x32xf32>
      %23 = arith.subf %21, %22 : vector<2x32xf32>
      %24 = vector.shape_cast %23 : vector<2x32xf32> to vector<1x2x32xf32>
      %cst_19 = arith.constant dense<0.000000e+00> : vector<1xf32>
      %25 = vector.multi_reduction <add>, %24, %cst_19 [1, 2] : vector<1x2x32xf32> to vector<1xf32>
      %26 = vector.shape_cast %25 : vector<1xf32> to vector<1x1x1xf32>
      %27 = vector.extract %26[0, 0, 0] : f32 from vector<1x1x1xf32>
      %cst_20 = arith.constant -5.000000e-01 : f32
      %28 = arith.mulf %cst_20, %27 : f32
      %29 = vector.broadcast %28 : f32 to vector<1x8x128xf32>
      %c0_21 = arith.constant 0 : index
      %c0_22 = arith.constant 0 : index
      %c0_23 = arith.constant 0 : index
      %30 = vector.load %arg7[%c0_21, %c0_22, %c0_23] : memref<1x8x128xf32, #tpu.memory_space<vmem>>, vector<1x8x128xf32>
      tpu.vector_store %arg7[%c0_21, %c0_22, %c0_23], %29 {strides = array<i32>} : memref<1x8x128xf32, #tpu.memory_space<vmem>>, vector<1x8x128xf32>,
    } else {
    }
    return
  }
  func.func @transform_0(%arg0: i32, %arg1: i32) -> (i32, i32) {
    %c1_i32 = arith.constant 1 : i32
    %0 = arith.muli %arg0, %c1_i32 : i32
    %1 = arith.addi %0, %arg1 : i32
    %c0_i32 = arith.constant 0 : i32
    %c0_i32_0 = arith.constant 0 : i32
    return %1, %c0_i32 : i32, i32
  }
  func.func @transform_1(%arg0: i32, %arg1: i32) -> (i32, i32) {
    %c1_i32 = arith.constant 1 : i32
    %0 = arith.muli %arg0, %c1_i32 : i32
    %1 = arith.addi %0, %arg1 : i32
    %c0_i32 = arith.constant 0 : i32
    %c0_i32_0 = arith.constant 0 : i32
    return %1, %c0_i32 : i32, i32
  }
  func.func @transform_2(%arg0: i32, %arg1: i32) -> (i32, i32) {
    %c0_i32 = arith.constant 0 : i32
    %c0_i32_0 = arith.constant 0 : i32
    %c0_i32_1 = arith.constant 0 : i32
    return %c0_i32, %c0_i32_0 : i32, i32
  }
  func.func @transform_3(%arg0: i32, %arg1: i32) -> (i32, i32) {
    %c0_i32 = arith.constant 0 : i32
    %c0_i32_0 = arith.constant 0 : i32
    %c0_i32_1 = arith.constant 0 : i32
    return %c0_i32, %c0_i32_0 : i32, i32
  }
  func.func @transform_4(%arg0: i32, %arg1: i32) -> (i32, i32, i32) {
    %c0_i32 = arith.constant 0 : i32
    %c0_i32_0 = arith.constant 0 : i32
    %c0_i32_1 = arith.constant 0 : i32
    return %arg0, %c0_i32, %c0_i32_0 : i32, i32, i32
  }
  func.func @transform_5(%arg0: i32, %arg1: i32) -> (i32, i32, i32) {
    %c0_i32 = arith.constant 0 : i32
    %c0_i32_0 = arith.constant 0 : i32
    %c0_i32_1 = arith.constant 0 : i32
    return %arg0, %c0_i32, %c0_i32_0 : i32, i32, i32
  }
}

</mosaic_0001>

<bundles_post_ra>
// kernel: vae_loss_mse.1
= control target key start
LH: loop header
LB: loop body
LE: loop exit
PB: predicated region body
PF: predicated region fallthrough
CT: control target
= control target key end

     0   :  { %vm94_vm0 = vcmask 254976   ;;  %s189_s0 = inlined_call_operand.vmem [shape: f32[2,1024], index: 0, kind: input, shape index: {}]   ;;  %s190_s1 = inlined_call_operand.vmem [shape: f32[2,1024], index: 1, kind: input, shape index: {}]   ;;  %s191_s3 = inlined_call_operand.vmem [shape: f32[2,32], index: 3, kind: input, shape index: {}]   ;;  %s192_s2 = inlined_call_operand.vmem [shape: f32[2,32], index: 2, kind: input, shape index: {}]   ;;  %s193_s4 = inlined_call_operand.vmem [shape: f32[1,2,1024], index: 4, kind: output, shape index: {0}]   ;;  %s194_s5 = inlined_call_operand.vmem [shape: f32[1,8,128], index: 5, kind: output, shape index: {1}]  }
   0x1   :  { %v65_v0 = vld [vmem:[%s189_s0] sm:$0xff]  ;;  %v66_v1 = vld [vmem:[%s189_s0 + $0x8] sm:$0xff] }
   0x2   :  { %v67_v2 = vld [vmem:[%s190_s1] sm:$0xff]  ;;  %v68_v3 = vld [vmem:[%s190_s1 + $0x8] sm:$0xff] }
   0x3   :  { %v69_v4 = vsub.f32 %v65_v0, %v67_v2  ;;  %v87_v5 = vld [vmem:[%s191_s3] sm:$0x3]  ;;  %v70_v6 = vsub.f32 %v66_v1, %v68_v3 }
   0x4   :  { %v91_v7 = vmul.f32 1.442695, %v87_v5  ;;  %v86_v10 = vld [vmem:[%s192_s2] sm:$0x3]  ;;  %v88_v11 = vadd.f32 1.0, %v87_v5 }
   0x5   :  { %v71_v8 = vmul.f32 %v69_v4, %v69_v4  ;;  %v72_v9 = vmul.f32 %v70_v6, %v70_v6  ;;  %v89_v12 = vmul.f32 %v86_v10, %v86_v10 }
   0x6   :  { %130 = vpow2.f32 %v91_v7 }
   0x7   :  { %84 = vst [vmem:[%s193_s4] sm:$0xff] %v71_v8  ;;  %85 = vst [vmem:[%s193_s4 + $0x8] sm:$0xff] %v72_v9  ;;  %v90_v13 = vsub.f32 %v88_v11, %v89_v12 }
  0x10   :  { %v131_v14 = vpop.eup %130 }
  0x11   :  { %v93_v15 = vsub.f32 %v90_v13, %v131_v14 }
  0x13   :  { %v95_v16 = vsel %vm94_vm0, %v93_v15, 0.0 }
  0x14   :  { %96 = vadd.xlane.f32.xlu0 %v95_v16 }
  0xa1   :  { %v97_v17 = vpop.xlane.xlu0 %96 }
  0xa2   :  { %v98_v18 = vrot.slane %v97_v17, 4 }
  0xa4   :  { %v99_v19 = vadd.f32 %v98_v18, %v97_v17 }
  0xa6   :  { %v100_v20 = vrot.slane %v99_v19, 2 }
  0xa8   :  { %v101_v21 = vadd.f32 %v100_v20, %v99_v19 }
  0xaa   :  { %v102_v22 = vrot.slane %v101_v21, 1 }
  0xac   :  { %v103_v23 = vadd.f32 %v102_v22, %v101_v21 }
  0xae   :  { %128 = vpush %v103_v23 }
  0xdf   :  { %s129_s2 = spop %128 }
  0xe0   :  { %s105_s3 = smul.f32 -0.5, %s129_s2 }
  0xe2   :  { %v106_v24 = vstv %s105_s3 }
  0xe3   :  { %107 = vst [vmem:[%s194_s5] sm:$0xff] %v106_v24 }

</bundles_post_ra>
